<compile_context>
chip_gen: v6e
topology: v6e:2x2x1
jax: 0.10.0
libtpu: 0.0.40
codegen_flags: <defaults>
</compile_context>

<pallas_src>
import jax
import jax.numpy as jnp
from jax import lax
from jax.experimental import pallas as pl
from jax.experimental.pallas import tpu as pltpu  # noqa: F401  (see scaling NOTE above)


def _gcb_kernel(a_ref, x_ref,
                wdm_ref, bdm_ref,            # dimension_mapping: D -> M
                wma_ref, wmp_ref, bm_ref,    # matrix: (N + M) -> M  (A part / P part)
                wt_ref, bt_ref,              # theta[0]: D -> O
                ap_ref, xo_ref):
    f32 = jnp.float32
    A = a_ref[...]                           # (B, N, N) f32
    X = x_ref[...]                           # (B, N, D) f32
    B, N, _ = A.shape
    D = X.shape[-1]
    M = wdm_ref.shape[-1]
    bdims = ((0,), (0,))                     # batch dims for dot_general

    # ---- Clustering assignment matrix --------------------------------------
    # Fused shared-LHS stage: A @ [X | Wma]  ->  A@X (lanes :D) and A@Wma (lanes D:)
    wma_b = jnp.broadcast_to(wma_ref[...][None], (B, N, M))
    rhs1 = jnp.concatenate([X, wma_b], axis=-1)                       # (B, N, D+M)
    t1 = lax.dot_general(A, rhs1, (((2,), (1,)), bdims),
                         preferred_element_type=f32)                  # (B, N, D+M)
    AX = t1[..., :D]                                                  # (B, N, D)
    AWma = t1[..., D:]                                                # (B, N, M)

    # P = sigmoid(AX @ Wdm + bdm): flattened across the batch -> one MXU pass.
    P = jax.nn.sigmoid(
        jnp.dot(AX.reshape(B * N, D), wdm_ref[...],
                preferred_element_type=f32) + bdm_ref[...])           # (B*N, M)

    # concat([A, P], -1) @ Wm == A@Wma + P@Wmp   (concat eliminated, exact)
    logits = (AWma.reshape(B * N, M)
              + jnp.dot(P, wmp_ref[...], preferred_element_type=f32)
              + bm_ref[...]).reshape(B, N, M)

    # softmax over the node axis (reference: F.softmax(..., dim=-2))
    mx = jnp.max(logits, axis=1, keepdims=True)
    ex = jnp.exp(logits - mx)
    denom = jnp.sum(ex, axis=1, keepdims=True)
    r = pl.reciprocal(denom, approx=True)     # EUP slot (otherwise idle)
    r = r * (2.0 - denom * r)                 # one Newton step -> rel err ~1e-7
    S = ex * r                                # (B, N, M)

    # ---- Pooling ------------------------------------------------------------
    # Fused shared-LHS stage: S^T @ [X | A] -> Xp (lanes :D) and S^T A (lanes D:).
    St = jnp.swapaxes(S, 1, 2)                                        # (B, M, N)  tiny XLU transpose
    rhs2 = jnp.concatenate([X, A], axis=-1)                           # (B, N, D+N)
    t2 = lax.dot_general(St, rhs2, (((2,), (1,)), bdims),
                         preferred_element_type=f32)                  # (B, M, D+N)
    Xp = t2[..., :D]                                                  # (B, M, D)
    StA = t2[..., D:]                                                 # (B, M, N)

    Ap = lax.dot_general(StA, S, (((2,), (1,)), bdims),
                         preferred_element_type=f32)                  # (B, M, M)

    # ---- MPNN_mk (k = 1, 'sum') + leaky_relu(0.01) --------------------------
    H = lax.dot_general(Ap, Xp, (((2,), (1,)), bdims),
                        preferred_element_type=f32)                   # (B, M, D)
    out = (jnp.dot(H.reshape(B * M, D), wt_ref[...],
                   preferred_element_type=f32) + bt_ref[...])         # (B*M, O)
    out = jnp.maximum(out, 0.01 * out)        # leaky_relu slope 0.01 (pure VALU)

    ap_ref[...] = Ap                          # (B, M, M)
    xo_ref[...] = out                         # (B*M, O) — split to (B, M, O) in wrapper


def graph_classification_block(A, X, params):
    """A: (B, N, N), X: (B, N, D). Returns (A_pooled (B, M, M), X_out (B, M, O))."""
    B, N, _ = A.shape
    D = X.shape[-1]
    wdm, bdm, wma, wmp, bm, wt, bt = params
    M = wdm.shape[1]
    O = wt.shape[1]

    ap, xo_flat = pl.pallas_call(
        _gcb_kernel,
        out_shape=(jax.ShapeDtypeStruct((B, M, M), jnp.float32),
                   jax.ShapeDtypeStruct((B * M, O), jnp.float32)),
    )(A, X, wdm, bdm, wma, wmp, bm, wt, bt)

    # Metadata-only reshape outside the kernel (free).
    return ap, xo_flat.reshape(B, M, O)


def _reference(A, X, params):
    """Pure-JAX reference mirroring the PyTorch forward exactly."""
    wdm, bdm, wma, wmp, bm, wt, bt = params
    AX = jnp.einsum('bij,bjd->bid', A, X)
    P = jax.nn.sigmoid(AX @ wdm + bdm)
    logits = A @ wma + P @ wmp + bm
    S = jax.nn.softmax(logits, axis=-2)
    Xp = jnp.einsum('bnm,bnd->bmd', S, X)
    Ap = jnp.einsum('bnm,bnk,bkl->bml', S, A, S)
    H = jnp.einsum('bml,bld->bmd', Ap, Xp)
    out = H @ wt + bt
    out = jnp.where(out >= 0, out, 0.01 * out)
    return Ap, out


if __name__ == "__main__":
    # Module hyperparameters (small, TPU-friendly).
    B = 4            # batch
    N = 16           # in_nodes
    D = 32           # input_dimension
    M = 8            # out_nodes (== hidden_dimension in the module)
    O = 32           # out_dimension

    key = jax.random.PRNGKey(0)
    k = jax.random.split(key, 8)

    A = jax.random.normal(k[0], (B, N, N), dtype=jnp.float32)
    X = jax.random.normal(k[1], (B, N, D), dtype=jnp.float32)

    # Deterministic parameter init (Linear weights stored as (in, out)).
    scale = 0.1
    wdm = scale * jax.random.normal(k[2], (D, M), dtype=jnp.float32)          # dimension_mapping
    bdm = scale * jax.random.normal(k[3], (1, M), dtype=jnp.float32)
    wm_full = scale * jax.random.normal(k[4], (N + M, M), dtype=jnp.float32)  # matrix: (N+M)->M
    wma, wmp = wm_full[:N], wm_full[N:]
    bm = scale * jax.random.normal(k[5], (1, M), dtype=jnp.float32)
    wt = scale * jax.random.normal(k[6], (D, O), dtype=jnp.float32)           # theta[0]
    bt = scale * jax.random.normal(k[7], (1, O), dtype=jnp.float32)

    params = (wdm, bdm, wma, wmp, bm, wt, bt)

    fwd = jax.jit(graph_classification_block)
    Ap, Xout = fwd(A, X, params)
    (Ap, Xout) = jax.block_until_ready((Ap, Xout))

    Ap_ref, Xout_ref = _reference(A, X, params)
    assert jnp.allclose(Ap, Ap_ref, atol=1e-4, rtol=1e-4)
    assert jnp.allclose(Xout, Xout_ref, atol=1e-4, rtol=1e-4)

    print("KERNEL_OK")
</pallas_src>

<mosaic_0001>
module attributes {stable_mosaic.version = 11 : i64} {
  func.func @_gcb_kernel(%arg0: memref<4x16x16xf32, #tpu.memory_space<vmem>>, %arg1: memref<4x16x32xf32, #tpu.memory_space<vmem>>, %arg2: memref<32x8xf32, #tpu.memory_space<vmem>>, %arg3: memref<1x8xf32, #tpu.memory_space<vmem>>, %arg4: memref<16x8xf32, #tpu.memory_space<vmem>>, %arg5: memref<8x8xf32, #tpu.memory_space<vmem>>, %arg6: memref<1x8xf32, #tpu.memory_space<vmem>>, %arg7: memref<32x32xf32, #tpu.memory_space<vmem>>, %arg8: memref<1x32xf32, #tpu.memory_space<vmem>>, %arg9: memref<4x8x8xf32, #tpu.memory_space<vmem>>, %arg10: memref<32x32xf32, #tpu.memory_space<vmem>>) attributes {dimension_semantics = [], scalar_prefetch = 0 : i64, scratch_operands = 0 : i64, tpu.core_type = #tpu.core_type<tc>} {
    %c0 = arith.constant 0 : index
    %c0_0 = arith.constant 0 : index
    %c0_1 = arith.constant 0 : index
    %0 = vector.load %arg0[%c0, %c0_0, %c0_1] : memref<4x16x16xf32, #tpu.memory_space<vmem>>, vector<4x16x16xf32>
    %c0_2 = arith.constant 0 : index
    %c0_3 = arith.constant 0 : index
    %c0_4 = arith.constant 0 : index
    %1 = vector.load %arg1[%c0_2, %c0_3, %c0_4] : memref<4x16x32xf32, #tpu.memory_space<vmem>>, vector<4x16x32xf32>
    %c0_5 = arith.constant 0 : index
    %c0_6 = arith.constant 0 : index
    %2 = vector.load %arg4[%c0_5, %c0_6] : memref<16x8xf32, #tpu.memory_space<vmem>>, vector<16x8xf32>
    %3 = vector.shape_cast %2 : vector<16x8xf32> to vector<1x16x8xf32>
    %4 = vector.shape_cast %3 : vector<1x16x8xf32> to vector<1x16x8xf32>
    %5 = vector.broadcast %4 : vector<1x16x8xf32> to vector<4x16x8xf32>
    %6 = tpu.concatenate %1, %5 in 2 : vector<4x16x32xf32>, vector<4x16x8xf32> -> vector<4x16x40xf32>
    %cst = arith.constant dense<0.000000e+00> : vector<4x16x40xf32>
    %7 = tpu.matmul %0, %6, %cst {dimension_numbers = #tpu.dot_dimension_numbers<[2], [1], [1], [2], [0, 0, 0, 1, 1, 2], [0], [0]>} : vector<4x16x16xf32>, vector<4x16x40xf32>, vector<4x16x40xf32> -> vector<4x16x40xf32>
    %8 = vector.extract_strided_slice %7 {offsets = [0, 0, 0], sizes = [4, 16, 32], strides = [1, 1, 1]} : vector<4x16x40xf32> to vector<4x16x32xf32>
    %9 = vector.extract_strided_slice %7 {offsets = [0, 0, 32], sizes = [4, 16, 8], strides = [1, 1, 1]} : vector<4x16x40xf32> to vector<4x16x8xf32>
    %10 = vector.shape_cast %8 : vector<4x16x32xf32> to vector<64x32xf32>
    %c0_7 = arith.constant 0 : index
    %c0_8 = arith.constant 0 : index
    %11 = vector.load %arg2[%c0_7, %c0_8] : memref<32x8xf32, #tpu.memory_space<vmem>>, vector<32x8xf32>
    %cst_9 = arith.constant dense<0.000000e+00> : vector<64x8xf32>
    %12 = tpu.matmul %10, %11, %cst_9 {dimension_numbers = #tpu.dot_dimension_numbers<[1], [0], [0], [1], [0, 0, 1, 1], [], []>} : vector<64x32xf32>, vector<32x8xf32>, vector<64x8xf32> -> vector<64x8xf32>
    %c0_10 = arith.constant 0 : index
    %c0_11 = arith.constant 0 : index
    %13 = vector.load %arg3[%c0_10, %c0_11] : memref<1x8xf32, #tpu.memory_space<vmem>>, vector<1x8xf32>
    %14 = vector.broadcast %13 : vector<1x8xf32> to vector<64x8xf32>
    %15 = arith.addf %12, %14 : vector<64x8xf32>
    %16 = arith.negf %15 : vector<64x8xf32>
    %17 = math.exp %16 : vector<64x8xf32>
    %cst_12 = arith.constant 1.000000e+00 : f32
    %18 = vector.broadcast %cst_12 : f32 to vector<64x8xf32>
    %19 = arith.addf %18, %17 : vector<64x8xf32>
    %20 = arith.divf %18, %19 : vector<64x8xf32>
    %21 = vector.shape_cast %9 : vector<4x16x8xf32> to vector<64x8xf32>
    %c0_13 = arith.constant 0 : index
    %c0_14 = arith.constant 0 : index
    %22 = vector.load %arg5[%c0_13, %c0_14] : memref<8x8xf32, #tpu.memory_space<vmem>>, vector<8x8xf32>
    %cst_15 = arith.constant dense<0.000000e+00> : vector<64x8xf32>
    %23 = tpu.matmul %20, %22, %cst_15 {dimension_numbers = #tpu.dot_dimension_numbers<[1], [0], [0], [1], [0, 0, 1, 1], [], []>} : vector<64x8xf32>, vector<8x8xf32>, vector<64x8xf32> -> vector<64x8xf32>
    %24 = arith.addf %21, %23 : vector<64x8xf32>
    %c0_16 = arith.constant 0 : index
    %c0_17 = arith.constant 0 : index
    %25 = vector.load %arg6[%c0_16, %c0_17] : memref<1x8xf32, #tpu.memory_space<vmem>>, vector<1x8xf32>
    %26 = vector.broadcast %25 : vector<1x8xf32> to vector<64x8xf32>
    %27 = arith.addf %24, %26 : vector<64x8xf32>
    %28 = vector.shape_cast %27 : vector<64x8xf32> to vector<4x16x8xf32>
    %cst_18 = arith.constant dense<0xFF800000> : vector<4x8xf32>
    %29 = vector.multi_reduction <maximumf>, %28, %cst_18 [1] : vector<4x16x8xf32> to vector<4x8xf32>
    %30 = vector.shape_cast %29 : vector<4x8xf32> to vector<4x1x8xf32>
    %31 = vector.broadcast %30 : vector<4x1x8xf32> to vector<4x16x8xf32>
    %32 = arith.subf %28, %31 : vector<4x16x8xf32>
    %33 = math.exp %32 : vector<4x16x8xf32>
    %cst_19 = arith.constant dense<0.000000e+00> : vector<4x8xf32>
    %34 = vector.multi_reduction <add>, %33, %cst_19 [1] : vector<4x16x8xf32> to vector<4x8xf32>
    %35 = vector.shape_cast %34 : vector<4x8xf32> to vector<4x1x8xf32>
    %36 = tpu.reciprocal %35 {approx = true} : vector<4x1x8xf32> -> vector<4x1x8xf32>
    %37 = arith.mulf %35, %36 : vector<4x1x8xf32>
    %cst_20 = arith.constant 2.000000e+00 : f32
    %38 = vector.broadcast %cst_20 : f32 to vector<4x1x8xf32>
    %39 = arith.subf %38, %37 : vector<4x1x8xf32>
    %40 = arith.mulf %36, %39 : vector<4x1x8xf32>
    %41 = vector.broadcast %40 : vector<4x1x8xf32> to vector<4x16x8xf32>
    %42 = arith.mulf %33, %41 : vector<4x16x8xf32>
    %43 = tpu.transpose %42, [0, 2, 1] : vector<4x16x8xf32> -> vector<4x8x16xf32>
    %44 = tpu.concatenate %1, %0 in 2 : vector<4x16x32xf32>, vector<4x16x16xf32> -> vector<4x16x48xf32>
    %cst_21 = arith.constant dense<0.000000e+00> : vector<4x8x48xf32>
    %45 = tpu.matmul %43, %44, %cst_21 {dimension_numbers = #tpu.dot_dimension_numbers<[2], [1], [1], [2], [0, 0, 0, 1, 1, 2], [0], [0]>} : vector<4x8x16xf32>, vector<4x16x48xf32>, vector<4x8x48xf32> -> vector<4x8x48xf32>
    %46 = vector.extract_strided_slice %45 {offsets = [0, 0, 0], sizes = [4, 8, 32], strides = [1, 1, 1]} : vector<4x8x48xf32> to vector<4x8x32xf32>
    %47 = vector.extract_strided_slice %45 {offsets = [0, 0, 32], sizes = [4, 8, 16], strides = [1, 1, 1]} : vector<4x8x48xf32> to vector<4x8x16xf32>
    %cst_22 = arith.constant dense<0.000000e+00> : vector<4x8x8xf32>
    %48 = tpu.matmul %47, %42, %cst_22 {dimension_numbers = #tpu.dot_dimension_numbers<[2], [1], [1], [2], [0, 0, 0, 1, 1, 2], [0], [0]>} : vector<4x8x16xf32>, vector<4x16x8xf32>, vector<4x8x8xf32> -> vector<4x8x8xf32>
    %cst_23 = arith.constant dense<0.000000e+00> : vector<4x8x32xf32>
    %49 = tpu.matmul %48, %46, %cst_23 {dimension_numbers = #tpu.dot_dimension_numbers<[2], [1], [1], [2], [0, 0, 0, 1, 1, 2], [0], [0]>} : vector<4x8x8xf32>, vector<4x8x32xf32>, vector<4x8x32xf32> -> vector<4x8x32xf32>
    %50 = vector.shape_cast %49 : vector<4x8x32xf32> to vector<32x32xf32>
    %c0_24 = arith.constant 0 : index
    %c0_25 = arith.constant 0 : index
    %51 = vector.load %arg7[%c0_24, %c0_25] : memref<32x32xf32, #tpu.memory_space<vmem>>, vector<32x32xf32>
    %cst_26 = arith.constant dense<0.000000e+00> : vector<32x32xf32>
    %52 = tpu.matmul %50, %51, %cst_26 {dimension_numbers = #tpu.dot_dimension_numbers<[1], [0], [0], [1], [0, 0, 1, 1], [], []>} : vector<32x32xf32>, vector<32x32xf32>, vector<32x32xf32> -> vector<32x32xf32>
    %c0_27 = arith.constant 0 : index
    %c0_28 = arith.constant 0 : index
    %53 = vector.load %arg8[%c0_27, %c0_28] : memref<1x32xf32, #tpu.memory_space<vmem>>, vector<1x32xf32>
    %54 = vector.broadcast %53 : vector<1x32xf32> to vector<32x32xf32>
    %55 = arith.addf %52, %54 : vector<32x32xf32>
    %cst_29 = arith.constant 0.00999999977 : f32
    %56 = vector.broadcast %cst_29 : f32 to vector<32x32xf32>
    %57 = arith.mulf %56, %55 : vector<32x32xf32>
    %58 = arith.maximumf %55, %57 : vector<32x32xf32>
    %c0_30 = arith.constant 0 : index
    %c0_31 = arith.constant 0 : index
    %c0_32 = arith.constant 0 : index
    %59 = vector.load %arg9[%c0_30, %c0_31, %c0_32] : memref<4x8x8xf32, #tpu.memory_space<vmem>>, vector<4x8x8xf32>
    tpu.vector_store %arg9[%c0_30, %c0_31, %c0_32], %48 {strides = array<i32>} : memref<4x8x8xf32, #tpu.memory_space<vmem>>, vector<4x8x8xf32>,
    %c0_33 = arith.constant 0 : index
    %c0_34 = arith.constant 0 : index
    %60 = vector.load %arg10[%c0_33, %c0_34] : memref<32x32xf32, #tpu.memory_space<vmem>>, vector<32x32xf32>
    tpu.vector_store %arg10[%c0_33, %c0_34], %58 {strides = array<i32>} : memref<32x32xf32, #tpu.memory_space<vmem>>, vector<32x32xf32>,
    return
  }
}

</mosaic_0001>

<bundles_post_ra>
// kernel: graph_classification_block.1
= control target key start
LH: loop header
LB: loop body
LE: loop exit
PB: predicated region body
PF: predicated region fallthrough
CT: control target
= control target key end

     0   :  { %16 = vsyncpa [#allocation3], 0  ;;  %s3023_s0 = inlined_call_operand.vmem [shape: f32[4,16,16], index: 0, kind: input, shape index: {}]   ;;  %s3024_s1 = inlined_call_operand.hbm [shape: f32[4,16,32], index: 1, kind: input, shape index: {}]   ;;  %s3025_s2 = inlined_call_operand.vmem [shape: f32[32,8], index: 2, kind: input, shape index: {}]   ;;  %s3026_s3 = inlined_call_operand.vmem [shape: f32[1,8], index: 3, kind: input, shape index: {}]   ;;  %s3027_s4 = inlined_call_operand.vmem [shape: f32[16,8], index: 4, kind: input, shape index: {}]   ;;  %s3028_s5 = inlined_call_operand.vmem [shape: f32[8,8], index: 5, kind: input, shape index: {}]   ;;  %s3029_s6 = inlined_call_operand.vmem [shape: f32[1,8], index: 6, kind: input, shape index: {}]   ;;  %s3030_s7 = inlined_call_operand.hbm [shape: f32[32,32], index: 7, kind: input, shape index: {}]   ;;  %s3031_s8 = inlined_call_operand.vmem [shape: f32[1,32], index: 8, kind: input, shape index: {}]   ;;  %s3032_s9 = inlined_call_operand.hbm [shape: f32[4,8,8], index: 9, kind: output, shape index: {0}]   ;;  %s3033_s10 = inlined_call_operand.hbm [shape: f32[32,32], index: 10, kind: output, shape index: {1}]  }
   0x1   :  { %17 = vsyncpa [#allocation6], 0 }
   0x2   :  { %18 = vsyncpa [#allocation4], 0 }
   0x3   :  { %19 = vsyncpa [#allocation9], 0  ;;  %s2589_s13 = smov [#allocation2]  }
   0x4   :  { %s27_s14 = sshll.u32 %s2589_s13, 4  ;;  %s28_s14 = int_to_ptr.vmem [resolvable:$true] %s27_s14 }
   0x5   :  { %s2509_s15 = scalar_lea.vmem %s28_s14, 1024  ;;  %p2514_p1 = scmp.lt.s32.totalorder %s28_s14, %s28_s14 }
   0x6   :  { %p2510_p0 = scmp.ne.s32.totalorder %s28_s14, %s2509_s15  ;;  %p2515_p2 = scmp.lt.s32.totalorder %s2509_s15, %s2509_s15 }
   0x8   :  { %p2516_p3 = por %p2515_p2, %p2514_p1 }
   0xa   :  { %p2517_p4 = pnand %p2516_p3, %p2510_p0 }
   0xc   :  { %2520 = shalt.err (!%p2517_p4)
}
   0xd   :  { %s2590_s16 = smov 128   ;;  %s2591_s17 = smov 8  }
   0xe   :  { %33 = dma.hbm_to_vmem [thread:$0]  %s3024_s1, 1024, %s28_s14, [#allocation3], %s2590_s16, %s2590_s16, %s2591_s17  }
   0xf   :  { %s2592_s20 = smov [#allocation5]  }
  0x10   :  { %s49_s21 = sshll.u32 %s2592_s20, 4  ;;  %s50_s21 = int_to_ptr.vmem [resolvable:$true] %s49_s21 }
  0x11   :  { %s2529_s22 = scalar_lea.vmem %s50_s21, 512  ;;  %p2534_p6 = scmp.lt.s32.totalorder %s50_s21, %s50_s21 }
  0x12   :  { %p2530_p5 = scmp.ne.s32.totalorder %s50_s21, %s2529_s22  ;;  %p2535_p7 = scmp.lt.s32.totalorder %s2529_s22, %s2529_s22 }
  0x14   :  { %p2536_p8 = por %p2535_p7, %p2534_p6 }
  0x16   :  { %p2537_p9 = pnand %p2536_p8, %p2530_p5 }
  0x18   :  { %2540 = shalt.err (!%p2537_p9)
}
  0x19   :  { %55 = dma.hbm_to_vmem [thread:$0]  %s3030_s7, 512, %s50_s21, [#allocation6], %s2590_s16, %s2590_s16, %s2591_s17  }
  0x1a   :  { %2581 = dma.done.wait [#allocation3], 1024  }
  0x1b   :  { %2582 = vsyncadd [#allocation3], 4294966272 }
  0x1c   :  { %2583 = dma.done.wait [#allocation6], 512  }
  0x1d   :  { %2584 = vsyncadd [#allocation6], 4294966784  ;;  %v81_v0 = vld [vmem:[%s3027_s4 + $0x8] sm:$0xff]  ;;  %vm99_vm0 = vcmask 130048   ;;  %s2593_s26 = smov 32   ;;  %v80_v1 = vld [vmem:[%s3027_s4] sm:$0xff] }
  0x1e   :  { %86 = vrot.lane.b32.xlu0 %v81_v0, %s2593_s26  ;;  %v2676_v2 = vld [vmem:[%s3023_s0] sm:$0xff]  ;;  %v2684_v3 = vld [vmem:[%s3023_s0 + $0x30] sm:$0xff]  ;;  %v2688_v4 = vld [vmem:[#allocation2 + $0x8] sm:$0xff]  ;;  %vm90_vm1 = vcmask 261120   ;;  %vm613_vm2 = vcmask 64512   ;;  %vm800_vm3 = vcmask 326912  }
  0x1f   :  { %2287 = vmatprep.mubr.msk.f32.mxu0 %vm99_vm0, %v2676_v2  ;;  %2308 = vmatprep.mubr.msk.f32.mxu1 %vm99_vm0, %v2684_v3  ;;  %v2690_v5 = vld [vmem:[#allocation2 + $0x38] sm:$0xff]  ;;  %v2696_v9 = vld [vmem:[#allocation2] sm:$0xff]  ;;  %v2698_v10 = vld [vmem:[#allocation2 + $0x30] sm:$0xff]  ;;  %vm2596_vm4 = vmmov 0  }
  0x20   :  { %v2700_v12 = vld [vmem:[#allocation2 + $0x18] sm:$0xff]  ;;  %v2709_v15 = vld [vmem:[%s3023_s0 + $0x8] sm:$0xff]  ;;  %v2711_v16 = vld [vmem:[#allocation2 + $0x10] sm:$0xff] }
  0x21   :  { %v2716_v17 = vld [vmem:[%s3023_s0 + $0x10] sm:$0xff]  ;;  %v2723_v19 = vld [vmem:[%s3023_s0 + $0x38] sm:$0xff]  ;;  %v2727_v20 = vld [vmem:[#allocation2 + $0x28] sm:$0xff] }
  0x22   :  { %84 = vrot.lane.b32.xlu0 %v80_v1, %s2593_s26  ;;  %v2736_v22 = vld [vmem:[%s3023_s0 + $0x18] sm:$0xff]  ;;  %v2738_v23 = vld [vmem:[#allocation2 + $0x20] sm:$0xff]  ;;  %v2758_v27 = vld [vmem:[%s3023_s0 + $0x28] sm:$0xff] }
  0x23   :  { %v2743_v24 = vld [vmem:[%s3023_s0 + $0x20] sm:$0xff]  ;;  %v427_v28 = vld [vmem:[%s3025_s2 + $0x18] sm:$0xff]  ;;  %v426_v29 = vld [vmem:[%s3025_s2 + $0x10] sm:$0xff] }
  0x24   :  { %v425_v30 = vld [vmem:[%s3025_s2 + $0x8] sm:$0xff]  ;;  %v424_v31 = vld [vmem:[%s3025_s2] sm:$0xff] }
  0x25   :  { %v612_v40 = vld [vmem:[%s3028_s5] sm:$0xff] }
  0x26   :  { %v2163_v41 = vld [vmem:[%s3026_s3] ss:$0 sm:$0xff] }
  0x90   :  { %v87_v6 = vpop.permute.xlu0 %86 }
  0x91   :  { %v92_v7 = vsel %vm90_vm1, %v2688_v4, %v87_v6  ;;  %v98_v8 = vsel %vm90_vm1, %v2690_v5, %v87_v6  ;;  %v94_v18 = vsel %vm90_vm1, %v2700_v12, %v87_v6  ;;  %v96_v25 = vsel %vm90_vm1, %v2727_v20, %v87_v6 }
  0x92   :  { %2283 = vmatprep.subr.mxu0 %v92_v7  ;;  %2304 = vmatprep.subr.mxu1 %v98_v8 }
  0x93   :  { %2284 = vmatpush3.msra.mxu0 %v92_v7  ;;  %2305 = vmatpush3.msra.mxu1 %v98_v8 }
  0x94   :  { %v85_v11 = vpop.permute.xlu0 %84 }
  0x95   :  { %v91_v13 = vsel %vm90_vm1, %v2696_v9, %v85_v11  ;;  %v97_v14 = vsel %vm90_vm1, %v2698_v10, %v85_v11  ;;  %v93_v21 = vsel %vm90_vm1, %v2711_v16, %v85_v11  ;;  %v95_v26 = vsel %vm90_vm1, %v2738_v23, %v85_v11 }
  0x96   :  { %2285 = vmatprep.subr.mxu0 %v91_v13  ;;  %2306 = vmatprep.subr.mxu1 %v97_v14 }
  0x97   :  { %2286 = vmatpush3.msra.mxu0 %v91_v13  ;;  %2307 = vmatpush3.msra.mxu1 %v97_v14 }
  0x98   :  { %2288 = vmatmul.mubr.msk.f32.vlgmr.msra.gmra.mxu0 %vm99_vm0, %v2709_v15  ;;  %2290 = vmatprep.subr.mxu0 %v94_v18 }
  0x99   :  { %2291 = vmatpush3.msra.mxu0 %v94_v18  ;;  %2294 = vmatprep.mubr.msk.f32.mxu0 %vm99_vm0, %v2716_v17 }
  0x9a   :  { %2292 = vmatprep.subr.mxu0 %v93_v21  ;;  %2309 = vmatmul.mubr.msk.f32.vlgmr.msra.gmra.mxu1 %vm99_vm0, %v2723_v19 }
  0x9b   :  { %2293 = vmatpush3.msra.mxu0 %v93_v21  ;;  %2331 = vmatprep.subr.mxu1 %v612_v40 }
  0x9c   :  { %2295 = vmatmul.mubr.msk.f32.vlgmr.msra.gmra.mxu0 %vm99_vm0, %v2736_v22  ;;  %2297 = vmatprep.subr.mxu0 %v96_v25 }
  0x9d   :  { %2298 = vmatpush3.msra.mxu0 %v96_v25  ;;  %2301 = vmatprep.mubr.msk.f32.mxu0 %vm99_vm0, %v2743_v24 }
  0x9e   :  { %2299 = vmatprep.subr.mxu0 %v95_v26  ;;  %2332 = vmatpush3.msra.mxu1 %v612_v40 }
  0x9f   :  { %2300 = vmatpush3.msra.mxu0 %v95_v26 }
  0xa0   :  { %2302 = vmatmul.mubr.msk.f32.vlgmr.msra.gmra.mxu0 %vm99_vm0, %v2758_v27  ;;  %2311 = vmatprep.subr.mxu0 %v427_v28 }
  0xa1   :  { %2312 = vmatpush3.msra.mxu0 %v427_v28 }
  0xa2   :  { %2313 = vmatprep.subr.mxu0 %v426_v29 }
  0xa3   :  { %2314 = vmatpush3.msra.mxu0 %v426_v29 }
  0xa4   :  { %2315 = vmatprep.subr.mxu0 %v425_v30 }
  0xa5   :  { %2316 = vmatpush3.msra.mxu0 %v425_v30 }
  0xa6   :  { %2317 = vmatprep.subr.mxu0 %v424_v31 }
  0xa7   :  { %2318 = vmatpush3.msra.mxu0 %v424_v31 }
 0x158   :  { %v2774_v32 = vpop.f32.mrf.mxu0 }
 0x15a   :  { %v2776_v33 = vpop.f32.mrf.mxu0  ;;  %v2786_v36 = vpop.f32.mrf.mxu1 }
 0x15b   :  { %2319 = vmatprep.mubr.msk.f32.mxu0 %vm90_vm1, %v2776_v33 }
 0x15c   :  { %v2780_v34 = vpop.f32.mrf.mxu0  ;;  %2320 = vmatmul.mubr.msk.f32.vlgmr.msra.gmra.mxu0 %vm90_vm1, %v2774_v32  ;;  %v2796_v39 = vpop.f32.mrf.mxu1 }
 0x15e   :  { %v2784_v35 = vpop.f32.mrf.mxu0 }
 0x15f   :  { %2322 = vmatprep.mubr.msk.f32.mxu0 %vm90_vm1, %v2784_v35 }
 0x160   :  { %v2790_v37 = vpop.f32.mrf.mxu0  ;;  %2323 = vmatmul.mubr.msk.f32.gmra.mxu0 %vm90_vm1, %v2780_v34 }
 0x162   :  { %v2794_v38 = vpop.f32.mrf.mxu0 }
 0x163   :  { %2325 = vmatprep.mubr.msk.f32.mxu0 %vm90_vm1, %v2794_v38 }
 0x164   :  { %2326 = vmatmul.mubr.msk.f32.gmra.mxu0 %vm90_vm1, %v2790_v37 }
 0x165   :  { %2328 = vmatprep.mubr.msk.f32.mxu0 %vm90_vm1, %v2796_v39 }
 0x168   :  { %2329 = vmatmul.mubr.msk.f32.gmra.mxu0 %vm90_vm1, %v2786_v36 }
 0x21c   :  { %v2321_v42 = vpop.f32.mrf.mxu0 }
 0x21d   :  { %v531_v43 = vadd.f32 %v2321_v42, %v2163_v41 }
 0x21e   :  { %v525_v44 = vpop.f32.mrf.mxu0 }
 0x21f   :  { %v2173_v45 = vmul.f32 -1.442695, %v531_v43  ;;  %v526_v46 = vadd.f32 %v2163_v41, %v525_v44 }
 0x220   :  { %v2324_v47 = vpop.f32.mrf.mxu0 }
 0x221   :  { %2445 = vpow2.f32 %v2173_v45  ;;  %v2172_v48 = vmul.f32 -1.442695, %v526_v46  ;;  %v541_v49 = vadd.f32 %v2324_v47, %v2163_v41 }
 0x222   :  { %v535_v50 = vpop.f32.mrf.mxu0 }
 0x223   :  { %2447 = vpow2.f32 %v2172_v48  ;;  %v2175_v51 = vmul.f32 -1.442695, %v541_v49  ;;  %v536_v52 = vadd.f32 %v2163_v41, %v535_v50  ;;  %v2188_v50 = vld [vmem:[%s3029_s6] ss:$0 sm:$0xff]  ;;  %s2595_s6 = smov 96  }
 0x224   :  { %v2327_v53 = vpop.f32.mrf.mxu0  ;;  %789 = vrot.lane.b32.xlu0 %v2188_v50, %s2593_s26 }
 0x225   :  { %2449 = vpow2.f32 %v2175_v51  ;;  %v2174_v54 = vmul.f32 -1.442695, %v536_v52  ;;  %v551_v55 = vadd.f32 %v2327_v53, %v2163_v41 }
 0x226   :  { %v545_v56 = vpop.f32.mrf.mxu0 }
 0x227   :  { %2451 = vpow2.f32 %v2174_v54  ;;  %v2177_v57 = vmul.f32 -1.442695, %v551_v55  ;;  %v546_v58 = vadd.f32 %v2163_v41, %v545_v56 }
 0x228   :  { %v2330_v59 = vpop.f32.mrf.mxu0 }
 0x229   :  { %2453 = vpow2.f32 %v2177_v57  ;;  %v2176_v60 = vmul.f32 -1.442695, %v546_v58  ;;  %v561_v61 = vadd.f32 %v2330_v59, %v2163_v41 }
 0x22a   :  { %v555_v62 = vpop.f32.mrf.mxu0 }
 0x22b   :  { %2455 = vpow2.f32 %v2176_v60  ;;  %v2179_v63 = vmul.f32 -1.442695, %v561_v61  ;;  %v556_v0 = vadd.f32 %v2163_v41, %v555_v62 }
 0x22d   :  { %2457 = vpow2.f32 %v2179_v63  ;;  %v2178_v1 = vmul.f32 -1.442695, %v556_v0 }
 0x22e   :  { %v2446_v6 = vpop.eup %2445 }
 0x22f   :  { %2459 = vpow2.f32 %v2178_v1  ;;  %v589_v8 = vadd.f32 1.0, %v2446_v6 }
 0x230   :  { %v2448_v7 = vpop.eup %2447 }
 0x231   :  { %v588_v11 = vadd.f32 1.0, %v2448_v7 }
 0x232   :  { %v2450_v13 = vpop.eup %2449 }
 0x233   :  { %2461 = vrcp.f32 %v588_v11  ;;  %v591_v18 = vadd.f32 1.0, %v2450_v13 }
 0x234   :  { %v2452_v14 = vpop.eup %2451  ;;  %2463 = vrcp.f32 %v589_v8 }
 0x235   :  { %v590_v21 = vadd.f32 1.0, %v2452_v14 }
 0x236   :  { %v2454_v25 = vpop.eup %2453 }
 0x237   :  { %2465 = vrcp.f32 %v590_v21  ;;  %v593_v28 = vadd.f32 1.0, %v2454_v25 }
 0x238   :  { %v2456_v26 = vpop.eup %2455  ;;  %2467 = vrcp.f32 %v591_v18 }
 0x239   :  { %v592_v29 = vadd.f32 1.0, %v2456_v26 }
 0x23a   :  { %v2458_v30 = vpop.eup %2457 }
 0x23b   :  { %2469 = vrcp.f32 %v592_v29  ;;  %v595_v40 = vadd.f32 1.0, %v2458_v30 }
 0x23c   :  { %v2460_v31 = vpop.eup %2459  ;;  %2471 = vrcp.f32 %v593_v28 }
 0x23d   :  { %v594_v41 = vadd.f32 1.0, %v2460_v31 }
 0x23f   :  { %2473 = vrcp.f32 %v594_v41 }
 0x240   :  { %v2462_v42 = vpop.eup %2461  ;;  %2475 = vrcp.f32 %v595_v40 }
 0x241   :  { %v2464_v43 = vpop.eup %2463  ;;  %2333 = vmatprep.mubr.msk.f32.mxu1 %vm613_vm2, %v2462_v42 }
 0x242   :  { %2334 = vmatmul.mubr.msk.f32.vlgmr.msra.gmra.mxu1 %vm613_vm2, %v2464_v43 }
 0x244   :  { %v2466_v44 = vpop.eup %2465 }
 0x245   :  { %v2468_v45 = vpop.eup %2467  ;;  %2336 = vmatprep.mubr.msk.f32.mxu1 %vm613_vm2, %v2466_v44 }
 0x246   :  { %2337 = vmatmul.mubr.msk.f32.gmra.mxu1 %vm613_vm2, %v2468_v45 }
 0x248   :  { %v2470_v46 = vpop.eup %2469 }
 0x249   :  { %v2472_v47 = vpop.eup %2471  ;;  %2339 = vmatprep.mubr.msk.f32.mxu1 %vm613_vm2, %v2470_v46 }
 0x24a   :  { %2340 = vmatmul.mubr.msk.f32.gmra.mxu1 %vm613_vm2, %v2472_v47 }
 0x24c   :  { %v2474_v48 = vpop.eup %2473 }
 0x24d   :  { %v2476_v49 = vpop.eup %2475  ;;  %2342 = vmatprep.mubr.msk.f32.mxu1 %vm613_vm2, %v2474_v48 }
 0x24e   :  { %2343 = vmatmul.mubr.msk.f32.gmra.mxu1 %vm613_vm2, %v2476_v49 }
 0x296   :  { %v790_v60 = vpop.permute.xlu0 %789 }
 0x302   :  { %v2335_v51 = vpop.f32.mrf.mxu1 }
 0x303   :  { %753 = vrot.lane.b32.xlu1 %v2335_v51, %s2593_s26 }
 0x304   :  { %v704_v52 = vpop.f32.mrf.mxu1 }
 0x306   :  { %v2338_v53 = vpop.f32.mrf.mxu1 }
 0x307   :  { %751 = vrot.lane.b32.xlu1 %v704_v52, %s2593_s26 }
 0x308   :  { %v714_v54 = vpop.f32.mrf.mxu1 }
 0x309   :  { %755 = vrot.lane.b32.xlu0 %v714_v54, %s2593_s26 }
 0x30a   :  { %v2341_v55 = vpop.f32.mrf.mxu1 }
 0x30b   :  { %757 = vrot.lane.b32.xlu1 %v2338_v53, %s2593_s26 }
 0x30c   :  { %v724_v56 = vpop.f32.mrf.mxu1 }
 0x30d   :  { %761 = vrot.lane.b32.xlu0 %v2341_v55, %s2593_s26 }
 0x30e   :  { %v2344_v57 = vpop.f32.mrf.mxu1 }
 0x30f   :  { %759 = vrot.lane.b32.xlu1 %v724_v56, %s2593_s26 }
 0x310   :  { %v734_v58 = vpop.f32.mrf.mxu1 }
 0x311   :  { %765 = vrot.lane.b32.xlu0 %v2344_v57, %s2593_s26 }
 0x313   :  { %763 = vrot.lane.b32.xlu1 %v734_v58, %s2593_s26 }
 0x317   :  { %1083 = vrot.lane.b32.xlu1 %v2709_v15, %s2593_s26 }
 0x375   :  { %v754_v59 = vpop.permute.xlu1 %753 }
 0x376   :  { %v776_v61 = vadd.f32 %v2774_v32, %v754_v59 }
 0x378   :  { %v793_v63 = vadd.f32 %v790_v60, %v776_v61 }
 0x379   :  { %v752_v62 = vpop.permute.xlu1 %751 }
 0x37a   :  { %v775_v0 = vadd.f32 %v752_v62, %v2776_v33  ;;  %v802_v11 = vsel %vm800_vm3, %v793_v63, -inf }
 0x37b   :  { %v756_v1 = vpop.permute.xlu0 %755 }
 0x37c   :  { %v792_v6 = vadd.f32 %v790_v60, %v775_v0  ;;  %v777_v7 = vadd.f32 %v756_v1, %v2784_v35 }
 0x37d   :  { %v758_v8 = vpop.permute.xlu1 %757 }
 0x37e   :  { %v801_v13 = vsel %vm800_vm3, %v792_v6, -inf  ;;  %v794_v14 = vadd.f32 %v790_v60, %v777_v7  ;;  %v778_v15 = vadd.f32 %v2780_v34, %v758_v8 }
 0x37f   :  { %v803_v18 = vmax.f32 %v801_v13, %v802_v11  ;;  %v762_v21 = vpop.permute.xlu0 %761 }
 0x380   :  { %v795_v32 = vadd.f32 %v790_v60, %v778_v15  ;;  %v780_v25 = vadd.f32 %v2790_v37, %v762_v21  ;;  %v810_v28 = vsel %vm800_vm3, %v794_v14, -inf }
 0x381   :  { %v804_v26 = vrot.slane %v803_v18, 4  ;;  %v760_v33 = vpop.permute.xlu1 %759 }
 0x382   :  { %v811_v29 = vsel %vm800_vm3, %v795_v32, -inf  ;;  %v797_v35 = vadd.f32 %v790_v60, %v780_v25  ;;  %v779_v30 = vadd.f32 %v760_v33, %v2794_v38 }
 0x383   :  { %v805_v31 = vmax.f32 %v803_v18, %v804_v26  ;;  %v812_v40 = vmax.f32 %v810_v28, %v811_v29  ;;  %v766_v41 = vpop.permute.xlu0 %765 }
 0x384   :  { %v796_v42 = vadd.f32 %v790_v60, %v779_v30  ;;  %v782_v34 = vadd.f32 %v2786_v36, %v766_v41  ;;  %v820_v37 = vsel %vm800_vm3, %v797_v35, -inf }
 0x385   :  { %v806_v43 = vrot.slane %v805_v31, 2  ;;  %v813_v44 = vrot.slane %v812_v40, 4  ;;  %v764_v45 = vpop.permute.xlu1 %763 }
 0x386   :  { %v819_v46 = vsel %vm800_vm3, %v796_v42, -inf  ;;  %v799_v47 = vadd.f32 %v790_v60, %v782_v34  ;;  %v781_v48 = vadd.f32 %v764_v45, %v2796_v39 }
 0x387   :  { %v807_v49 = vmax.f32 %v805_v31, %v806_v43  ;;  %v814_v50 = vmax.f32 %v812_v40, %v813_v44  ;;  %v821_v51 = vmax.f32 %v819_v46, %v820_v37 }
 0x388   :  { %v798_v38 = vadd.f32 %v790_v60, %v781_v48  ;;  %v829_v55 = vsel %vm800_vm3, %v799_v47, -inf }
 0x389   :  { %v808_v52 = vrot.slane %v807_v49, 1  ;;  %v815_v53 = vrot.slane %v814_v50, 2  ;;  %v822_v54 = vrot.slane %v821_v51, 4 }
 0x38a   :  { %v828_v36 = vsel %vm800_vm3, %v798_v38, -inf }
 0x38b   :  { %v809_v56 = vmax.f32 %v807_v49, %v808_v52  ;;  %v816_v57 = vmax.f32 %v814_v50, %v815_v53  ;;  %v823_v58 = vmax.f32 %v821_v51, %v822_v54  ;;  %v830_v59 = vmax.f32 %v828_v36, %v829_v55 }
 0x38d   :  { %v837_v61 = vsub.f32 %v792_v6, %v809_v56  ;;  %v838_v62 = vsub.f32 %v793_v63, %v809_v56  ;;  %v817_v0 = vrot.slane %v816_v57, 1  ;;  %v824_v1 = vrot.slane %v823_v58, 2 }
 0x38e   :  { %v831_v39 = vrot.slane %v830_v59, 4 }
 0x38f   :  { %v845_v7 = vmul.f32 1.442695, %v837_v61  ;;  %v847_v8 = vmul.f32 1.442695, %v838_v62  ;;  %v818_v11 = vmax.f32 %v816_v57, %v817_v0  ;;  %v825_v60 = vmax.f32 %v823_v58, %v824_v1 }
 0x390   :  { %v832_v13 = vmax.f32 %v830_v59, %v831_v39 }
 0x391   :  { %2477 = vpow2.f32 %v845_v7  ;;  %v839_v15 = vsub.f32 %v794_v14, %v818_v11  ;;  %v840_v18 = vsub.f32 %v795_v32, %v818_v11  ;;  %v826_v21 = vrot.slane %v825_v60, 1 }
 0x392   :  { %2479 = vpow2.f32 %v847_v8  ;;  %v833_v25 = vrot.slane %v832_v13, 2 }
 0x393   :  { %v849_v26 = vmul.f32 1.442695, %v839_v15  ;;  %v851_v33 = vmul.f32 1.442695, %v840_v18  ;;  %v827_v28 = vmax.f32 %v825_v60, %v826_v21 }
 0x394   :  { %v834_v29 = vmax.f32 %v832_v13, %v833_v25 }
 0x395   :  { %2481 = vpow2.f32 %v849_v26  ;;  %v841_v63 = vsub.f32 %v796_v42, %v827_v28  ;;  %v842_v6 = vsub.f32 %v797_v35, %v827_v28 }
 0x396   :  { %2483 = vpow2.f32 %v851_v33  ;;  %v835_v30 = vrot.slane %v834_v29, 1 }
 0x397   :  { %v853_v31 = vmul.f32 1.442695, %v841_v63  ;;  %v855_v40 = vmul.f32 1.442695, %v842_v6 }
 0x398   :  { %v836_v41 = vmax.f32 %v834_v29, %v835_v30  ;;  %v1084_v30 = vpop.permute.xlu1 %1083 }
 0x399   :  { %2485 = vpow2.f32 %v853_v31 }
 0x39a   :  { %2487 = vpow2.f32 %v855_v40  ;;  %v843_v34 = vsub.f32 %v798_v38, %v836_v41  ;;  %v844_v14 = vsub.f32 %v799_v47, %v836_v41  ;;  %v1106_v40 = vsel %vm90_vm1, %v2688_v4, %v1084_v30 }
 0x39c   :  { %v857_v32 = vmul.f32 1.442695, %v843_v34  ;;  %v859_v43 = vmul.f32 1.442695, %v844_v14  ;;  %v2594_v34 = vmov 0.0  }
 0x39d   :  { %2345 = vmatprep.subr.mxu1 %v2594_v34  ;;  %2352 = vmatprep.subr.mxu0 %v2594_v34 }
 0x39e   :  { %v2850_v44 = vpop.eup %2477  ;;  %2489 = vpow2.f32 %v857_v32  ;;  %2346 = vmatpush3.msra.mxu1 %v1106_v40  ;;  %2349 = vmatprep.mubr.msk.f32.mxu1 %vm2596_vm4, %v2594_v34 }
 0x39f   :  { %v2852_v45 = vpop.eup %2479  ;;  %2491 = vpow2.f32 %v859_v43  ;;  %v861_v35 = vsel %vm800_vm3, %v2850_v44, 0.0  ;;  %2347 = vmatprep.subr.mxu1 %v2594_v34  ;;  %2356 = vmatprep.mubr.msk.f32.mxu0 %vm2596_vm4, %v2594_v34 }
 0x3a0   :  { %v862_v42 = vsel %vm800_vm3, %v2852_v45, 0.0 }
 0x3a1   :  { %v863_v37 = vadd.f32 %v862_v42, %v861_v35 }
 0x3a2   :  { %v2858_v46 = vpop.eup %2481 }
 0x3a3   :  { %v2860_v48 = vpop.eup %2483  ;;  %v864_v47 = vrot.slane %v863_v37, 4  ;;  %v870_v49 = vsel %vm800_vm3, %v2858_v46, 0.0 }
 0x3a4   :  { %v871_v50 = vsel %vm800_vm3, %v2860_v48, 0.0 }
 0x3a5   :  { %v865_v51 = vadd.f32 %v864_v47, %v863_v37  ;;  %v872_v38 = vadd.f32 %v871_v50, %v870_v49 }
 0x3a6   :  { %v2866_v52 = vpop.eup %2485 }
 0x3a7   :  { %v2868_v53 = vpop.eup %2487  ;;  %v866_v54 = vrot.slane %v865_v51, 2  ;;  %v873_v55 = vrot.slane %v872_v38, 4  ;;  %v879_v36 = vsel %vm800_vm3, %v2866_v52, 0.0 }
 0x3a8   :  { %v880_v56 = vsel %vm800_vm3, %v2868_v53, 0.0 }
 0x3a9   :  { %v867_v57 = vadd.f32 %v866_v54, %v865_v51  ;;  %v874_v58 = vadd.f32 %v873_v55, %v872_v38  ;;  %v881_v59 = vadd.f32 %v880_v56, %v879_v36 }
 0x3ab   :  { %v2490_v61 = vpop.eup %2489  ;;  %v868_v62 = vrot.slane %v867_v57, 1  ;;  %v875_v0 = vrot.slane %v874_v58, 2  ;;  %v882_v1 = vrot.slane %v881_v59, 4 }
 0x3ac   :  { %v2492_v39 = vpop.eup %2491  ;;  %v888_v7 = vsel %vm800_vm3, %v2490_v61, 0.0 }
 0x3ad   :  { %v869_v8 = vadd.f32 %v868_v62, %v867_v57  ;;  %v876_v11 = vadd.f32 %v875_v0, %v874_v58  ;;  %v883_v60 = vadd.f32 %v882_v1, %v881_v59  ;;  %v889_v13 = vsel %vm800_vm3, %v2492_v39, 0.0 }
 0x3ae   :  { %v890_v15 = vadd.f32 %v889_v13, %v888_v7 }
 0x3af   :  { %2493 = vrcp.f32 %v869_v8  ;;  %v877_v18 = vrot.slane %v876_v11, 1  ;;  %v884_v21 = vrot.slane %v883_v60, 2 }
 0x3b0   :  { %v891_v25 = vrot.slane %v890_v15, 4 }
 0x3b1   :  { %v878_v26 = vadd.f32 %v877_v18, %v876_v11  ;;  %v885_v33 = vadd.f32 %v884_v21, %v883_v60 }
 0x3b2   :  { %v892_v28 = vadd.f32 %v891_v25, %v890_v15 }
 0x3b3   :  { %2495 = vrcp.f32 %v878_v26  ;;  %v886_v29 = vrot.slane %v885_v33, 1 }
 0x3b4   :  { %v893_v63 = vrot.slane %v892_v28, 2 }
 0x3b5   :  { %v887_v6 = vadd.f32 %v886_v29, %v885_v33 }
 0x3b6   :  { %v894_v31 = vadd.f32 %v893_v63, %v892_v28 }
 0x3b7   :  { %2497 = vrcp.f32 %v887_v6 }
 0x3b8   :  { %v895_v41 = vrot.slane %v894_v31, 1 }
 0x3ba   :  { %v896_v14 = vadd.f32 %v895_v41, %v894_v31 }
 0x3bc   :  { %v2494_v32 = vpop.eup %2493  ;;  %2499 = vrcp.f32 %v896_v14 }
 0x3bd   :  { %v901_v43 = vmul.f32 %v2494_v32, %v869_v8 }
 0x3bf   :  { %v905_v35 = vsub.f32 2.0, %v901_v43 }
 0x3c0   :  { %v2496_v42 = vpop.eup %2495 }
 0x3c1   :  { %v909_v37 = vmul.f32 %v2494_v32, %v905_v35  ;;  %v902_v47 = vmul.f32 %v2496_v42, %v878_v26  ;;  %v2000_v32 = vld [vmem:[#allocation5 + $0x18] sm:$0xff] }
 0x3c3   :  { %v913_v4 = vmul.f32 %v2850_v44, %v909_v37  ;;  %v906_v49 = vsub.f32 2.0, %v902_v47  ;;  %v914_v55 = vmul.f32 %v2852_v45, %v909_v37  ;;  %v1999_v47 = vld [vmem:[#allocation5 + $0x10] sm:$0xff] }
 0x3c4   :  { %v2498_v50 = vpop.eup %2497 }
 0x3c5   :  { %929 = vrot.lane.b32.xlu1 %v913_v4, %s2595_s6  ;;  %v910_v51 = vmul.f32 %v2496_v42, %v906_v49  ;;  %v903_v38 = vmul.f32 %v2498_v50, %v887_v6 }
 0x3c7   :  { %v915_v54 = vmul.f32 %v2858_v46, %v910_v51  ;;  %v907_v36 = vsub.f32 2.0, %v903_v38  ;;  %v916_v44 = vmul.f32 %v2860_v48, %v910_v51 }
 0x3c9   :  { %v2500_v56 = vpop.eup %2499  ;;  %933 = vrot.lane.b32.xlu0 %v915_v54, %s2595_s6  ;;  %931 = vrot.lane.b32.xlu1 %v914_v55, %s2595_s6  ;;  %v911_v57 = vmul.f32 %v2498_v50, %v907_v36  ;;  %v1998_v50 = vld [vmem:[#allocation5 + $0x8] sm:$0xff] }
 0x3ca   :  { %v904_v58 = vmul.f32 %v2500_v56, %v896_v14 }
 0x3cb   :  { %v917_v59 = vmul.f32 %v2866_v52, %v911_v57  ;;  %v918_v45 = vmul.f32 %v2868_v53, %v911_v57 }
 0x3cc   :  { %v908_v62 = vsub.f32 2.0, %v904_v58 }
 0x3cd   :  { %935 = vrot.lane.b32.xlu0 %v916_v44, %s2595_s6  ;;  %937 = vrot.lane.b32.xlu1 %v917_v59, %s2595_s6 }
 0x3ce   :  { %v912_v46 = vmul.f32 %v2500_v56, %v908_v62 }
 0x3d0   :  { %v919_v0 = vmul.f32 %v2490_v61, %v912_v46  ;;  %v920_v1 = vmul.f32 %v2492_v39, %v912_v46 }
 0x3d1   :  { %939 = vrot.lane.b32.xlu1 %v918_v45, %s2595_s6 }
 0x3d2   :  { %941 = vrot.lane.b32.xlu0 %v919_v0, %s2595_s6 }
 0x3d5   :  { %1081 = vrot.lane.b32.xlu1 %v2676_v2, %s2593_s26 }
 0x3d6   :  { %943 = vrot.lane.b32.xlu0 %v920_v1, %s2595_s6 }
 0x3d9   :  { %1091 = vrot.lane.b32.xlu1 %v2758_v27, %s2593_s26 }
 0x3da   :  { %1087 = vrot.lane.b32.xlu0 %v2736_v22, %s2593_s26 }
 0x3dd   :  { %1089 = vrot.lane.b32.xlu1 %v2743_v24, %s2593_s26 }
 0x3de   :  { %1085 = vrot.lane.b32.xlu0 %v2716_v17, %s2593_s26 }
 0x3e2   :  { %1095 = vrot.lane.b32.xlu0 %v2723_v19, %s2593_s26 }
 0x3e6   :  { %1093 = vrot.lane.b32.xlu0 %v2684_v3, %s2593_s26  ;;  %s2597_s26 = smov [#allocation7]  }
 0x3e7   :  { %s2126_s13 = sshll.u32 %s2597_s26, 4  ;;  %s2127_s13 = int_to_ptr.vmem [resolvable:$true] %s2126_s13 }
 0x3e8   :  { %s2541_s14 = scalar_lea.vmem %s2127_s13, 512  ;;  %p2546_p11 = scmp.lt.s32.totalorder %s2127_s13, %s2127_s13 }
 0x3e9   :  { %p2542_p10 = scmp.ne.s32.totalorder %s2127_s13, %s2541_s14  ;;  %p2547_p12 = scmp.lt.s32.totalorder %s2541_s14, %s2541_s14 }
 0x3eb   :  { %p2548_p13 = por %p2547_p12, %p2546_p11 }
 0x3ed   :  { %p2549_p0 = pnand %p2548_p13, %p2542_p10 }
 0x437   :  { %v930_v2 = vpop.permute.xlu1 %929 }
 0x438   :  { %953 = vxpose.xlu1.b32.start [1/2] (short) (narrow) %v930_v2, 8 }
 0x43b   :  { %v934_v22 = vpop.permute.xlu0 %933  ;;  %v932_v27 = vpop.permute.xlu1 %931 }
 0x43c   :  { %985 = vxpose.xlu0.b32.start [1/2] (short) (narrow) %v934_v22, 8  ;;  %954 = vxpose.xlu1.b32.end [2/2] (short) (narrow) %v932_v27, 8 }
 0x43f   :  { %v936_v48 = vpop.permute.xlu0 %935  ;;  %v2913_v52 = vpop.permute.xlu1 %937 }
 0x440   :  { %986 = vxpose.xlu0.b32.end [2/2] (short) (narrow) %v936_v48, 8 }
 0x443   :  { %v2915_v24 = vpop.permute.xlu1 %939 }
 0x444   :  { %v2917_v53 = vpop.permute.xlu0 %941  ;;  %1017 = vxpose.xlu0.b32.start [1/2] (short) (narrow) %v2913_v52, 8 }
 0x445   :  { %1049 = vxpose.xlu1.b32.start [1/2] (short) (narrow) %v2917_v53, 8 }
 0x447   :  { %v1082_v17 = vpop.permute.xlu1 %1081 }
 0x448   :  { %v2921_v3 = vpop.permute.xlu0 %943  ;;  %1018 = vxpose.xlu0.b32.end [2/2] (short) (narrow) %v2915_v24, 8  ;;  %v1105_v19 = vsel %vm90_vm1, %v2696_v9, %v1082_v17 }
 0x449   :  { %1050 = vxpose.xlu1.b32.end [2/2] (short) (narrow) %v2921_v3, 8  ;;  %2348 = vmatpush3.msra.mxu1 %v1105_v19 }
 0x44a   :  { %2359 = vmatprep.subr.mxu1 %v2594_v34 }
 0x44b   :  { %v1092_v9 = vpop.permute.xlu1 %1091 }
 0x44c   :  { %v1088_v61 = vpop.permute.xlu0 %1087  ;;  %v1110_v18 = vsel %vm90_vm1, %v2727_v20, %v1092_v9 }
 0x44d   :  { %v1108_v39 = vsel %vm90_vm1, %v2700_v12, %v1088_v61 }
 0x44e   :  { %2353 = vmatpush3.msra.mxu0 %v1108_v39 }
 0x44f   :  { %2354 = vmatprep.subr.mxu0 %v2594_v34  ;;  %v1090_v60 = vpop.permute.xlu1 %1089 }
 0x450   :  { %v1086_v7 = vpop.permute.xlu0 %1085  ;;  %v1109_v12 = vsel %vm90_vm1, %v2738_v23, %v1090_v60 }
 0x451   :  { %v1107_v8 = vsel %vm90_vm1, %v2711_v16, %v1086_v7 }
 0x452   :  { %2355 = vmatpush3.msra.mxu0 %v1107_v8 }
 0x453   :  { %2366 = vmatprep.subr.mxu0 %v2594_v34 }
 0x454   :  { %v1096_v11 = vpop.permute.xlu0 %1095 }
 0x455   :  { %v1112_v21 = vsel %vm90_vm1, %v2690_v5, %v1096_v11 }
 0x458   :  { %v1094_v13 = vpop.permute.xlu0 %1093 }
 0x459   :  { %v1111_v20 = vsel %vm90_vm1, %v2698_v10, %v1094_v13 }
 0x4b4   :  { %v969_v15 = vpop.trf.xlu1 }
 0x4b5   :  { %2350 = vmatmul.mubr.msk.f32.vlgmr.msra.gmra.mxu1 %vm99_vm0, %v969_v15 }
 0x4b6   :  { %2360 = vmatpush3.msra.mxu1 %v1110_v18  ;;  %2363 = vmatprep.mubr.msk.f32.mxu1 %vm2596_vm4, %v2594_v34 }
 0x4b7   :  { %2361 = vmatprep.subr.mxu1 %v2594_v34 }
 0x4b8   :  { %2362 = vmatpush3.msra.mxu1 %v1109_v12  ;;  %v1001_v16 = vpop.trf.xlu0 }
 0x4b9   :  { %2357 = vmatmul.mubr.msk.f32.vlgmr.msra.gmra.mxu0 %vm99_vm0, %v1001_v16  ;;  %2373 = vmatprep.subr.mxu1 %v2594_v34 }
 0x4ba   :  { %2367 = vmatpush3.msra.mxu0 %v1112_v21  ;;  %2370 = vmatprep.mubr.msk.f32.mxu0 %vm2596_vm4, %v2594_v34 }
 0x4bb   :  { %2368 = vmatprep.subr.mxu0 %v2594_v34 }
 0x4bc   :  { %2369 = vmatpush3.msra.mxu0 %v1111_v20 }
 0x4bd   :  { %2380 = vmatprep.subr.mxu0 %v2594_v34 }
 0x4c0   :  { %v1033_v23 = vpop.trf.xlu0 }
 0x4c1   :  { %v1065_v25 = vpop.trf.xlu1  ;;  %2364 = vmatmul.mubr.msk.f32.vlgmr.msra.gmra.mxu1 %vm99_vm0, %v1033_v23 }
 0x4c2   :  { %2371 = vmatmul.mubr.msk.f32.vlgmr.msra.gmra.mxu0 %vm99_vm0, %v1065_v25  ;;  %2374 = vmatpush3.msra.mxu1 %v932_v27 }
 0x4c3   :  { %2381 = vmatpush3.msra.mxu0 %v936_v48  ;;  %2375 = vmatprep.subr.mxu1 %v2594_v34 }
 0x4c4   :  { %2382 = vmatprep.subr.mxu0 %v2594_v34  ;;  %2376 = vmatpush3.msra.mxu1 %v930_v2 }
 0x4c5   :  { %2383 = vmatpush3.msra.mxu0 %v934_v22  ;;  %2377 = vmatprep.mubr.msk.f32.mxu1 %vm2596_vm4, %v2594_v34 }
 0x4c6   :  { %2387 = vmatprep.subr.mxu1 %v2594_v34  ;;  %2384 = vmatprep.mubr.msk.f32.mxu0 %vm2596_vm4, %v2594_v34 }
 0x4c7   :  { %2394 = vmatprep.subr.mxu0 %v2594_v34 }
 0x575   :  { %v1182_v5 = vpop.f32.mrf.mxu1 }
 0x576   :  { %1406 = vrot.lane.b32.xlu0 %v1182_v5, %s2595_s6 }
 0x577   :  { %v2351_v10 = vpop.f32.mrf.mxu1 }
 0x579   :  { %v1255_v26 = vpop.f32.mrf.mxu0 }
 0x57a   :  { %1481 = vrot.lane.b32.xlu1 %v1255_v26, %s2595_s6 }
 0x57b   :  { %v2358_v33 = vpop.f32.mrf.mxu0 }
 0x581   :  { %v1328_v28 = vpop.f32.mrf.mxu1 }
 0x582   :  { %v1401_v29 = vpop.f32.mrf.mxu0  ;;  %1556 = vrot.lane.b32.xlu1 %v1328_v28, %s2595_s6 }
 0x583   :  { %1631 = vrot.lane.b32.xlu0 %v1401_v29, %s2595_s6  ;;  %v2365_v63 = vpop.f32.mrf.mxu1 }
 0x584   :  { %v2372_v6 = vpop.f32.mrf.mxu0 }
 0x5e8   :  { %v1407_v30 = vpop.permute.xlu0 %1406 }
 0x5e9   :  { %2378 = vmatmul.mubr.msk.f32.vlgmr.msra.gmra.mxu1 %vm99_vm0, %v1407_v30 }
 0x5ea   :  { %2388 = vmatpush3.msra.mxu1 %v2915_v24  ;;  %2391 = vmatprep.mubr.msk.f32.mxu1 %vm2596_vm4, %v2594_v34 }
 0x5eb   :  { %2389 = vmatprep.subr.mxu1 %v2594_v34 }
 0x5ec   :  { %2390 = vmatpush3.msra.mxu1 %v2913_v52  ;;  %v1482_v31 = vpop.permute.xlu1 %1481 }
 0x5ed   :  { %2385 = vmatmul.mubr.msk.f32.vlgmr.msra.gmra.mxu0 %vm99_vm0, %v1482_v31  ;;  %2401 = vmatprep.subr.mxu1 %v2594_v34 }
 0x5ee   :  { %2395 = vmatpush3.msra.mxu0 %v2921_v3  ;;  %2398 = vmatprep.mubr.msk.f32.mxu0 %vm2596_vm4, %v2594_v34 }
 0x5ef   :  { %2396 = vmatprep.subr.mxu0 %v2594_v34 }
 0x5f0   :  { %2397 = vmatpush3.msra.mxu0 %v2917_v53 }
 0x5f1   :  { %2406 = vmatprep.subr.mxu0 %v2594_v34 }
 0x5f4   :  { %v1557_v40 = vpop.permute.xlu1 %1556 }
 0x5f5   :  { %v1632_v41 = vpop.permute.xlu0 %1631  ;;  %2392 = vmatmul.mubr.msk.f32.vlgmr.msra.gmra.mxu1 %vm99_vm0, %v1557_v40 }
 0x5f6   :  { %2399 = vmatmul.mubr.msk.f32.vlgmr.msra.gmra.mxu0 %vm99_vm0, %v1632_v41  ;;  %2402 = vmatpush3.msra.mxu1 %v1182_v5 }
 0x5f7   :  { %2407 = vmatpush3.msra.mxu0 %v1255_v26  ;;  %2403 = vmatprep.mubr.msk.f32.mxu1 %vm2596_vm4, %v2594_v34 }
 0x5f8   :  { %2411 = vmatprep.subr.mxu1 %v2594_v34  ;;  %2408 = vmatprep.mubr.msk.f32.mxu0 %vm2596_vm4, %v2594_v34 }
 0x5f9   :  { %2416 = vmatprep.subr.mxu0 %v2594_v34 }
 0x6a9   :  { %v1476_v14 = vpop.f32.mrf.mxu1 }
 0x6aa   :  { %2113 = vst.msk [vmem:[#allocation7] sm:$0xff] %vm613_vm2, %v1476_v14  ;;  %2404 = vmatmul.mubr.msk.f32.vlgmr.msra.gmra.mxu1 %vm613_vm2, %v1476_v14 }
 0x6ab   :  { %2412 = vmatpush3.msra.mxu1 %v1328_v28  ;;  %v2379_v43 = vpop.f32.mrf.mxu1  ;;  %2413 = vmatprep.mubr.msk.f32.mxu1 %vm2596_vm4, %v2594_v34 }
 0x6ac   :  { %2421 = vmatprep.subr.mxu1 %v2000_v32 }
 0x6ad   :  { %v1551_v35 = vpop.f32.mrf.mxu0 }
 0x6ae   :  { %2114 = vst.msk [vmem:[#allocation7 + $0x8] sm:$0xff] %vm613_vm2, %v1551_v35  ;;  %2409 = vmatmul.mubr.msk.f32.vlgmr.msra.gmra.mxu0 %vm613_vm2, %v1551_v35 }
 0x6af   :  { %2417 = vmatpush3.msra.mxu0 %v1401_v29  ;;  %v2386_v42 = vpop.f32.mrf.mxu0  ;;  %2418 = vmatprep.mubr.msk.f32.mxu0 %vm2596_vm4, %v2594_v34  ;;  %v1997_v34 = vld [vmem:[#allocation5] sm:$0xff] }
 0x6b5   :  { %v1626_v37 = vpop.f32.mrf.mxu1 }
 0x6b6   :  { %2115 = vst.msk [vmem:[#allocation7 + $0x10] sm:$0xff] %vm613_vm2, %v1626_v37  ;;  %v1701_v4 = vpop.f32.mrf.mxu0  ;;  %2414 = vmatmul.mubr.msk.f32.vlgmr.msra.gmra.mxu1 %vm613_vm2, %v1626_v37 }
 0x6b7   :  { %2116 = vst.msk [vmem:[#allocation7 + $0x18] sm:$0xff] %vm613_vm2, %v1701_v4  ;;  %2419 = vmatmul.mubr.msk.f32.vlgmr.msra.gmra.mxu0 %vm613_vm2, %v1701_v4  ;;  %v2393_v49 = vpop.f32.mrf.mxu1  ;;  %2422 = vmatpush3.msra.mxu1 %v2000_v32 }
 0x6b8   :  { %v2400_v51 = vpop.f32.mrf.mxu0  ;;  %2423 = vmatprep.subr.mxu1 %v1999_v47 }
 0x6b9   :  { %2424 = vmatpush3.msra.mxu1 %v1999_v47 }
 0x6ba   :  { %2425 = vmatprep.subr.mxu1 %v1998_v50 }
 0x6bb   :  { %2426 = vmatpush3.msra.mxu1 %v1998_v50 }
 0x6bc   :  { %2427 = vmatprep.subr.mxu1 %v1997_v34 }
 0x6bd   :  { %2428 = vmatpush3.msra.mxu1 %v1997_v34 }
 0x76a   :  { %v1774_v38 = vpop.f32.mrf.mxu1 }
 0x76b   :  { %2429 = vmatprep.mubr.msk.f32.mxu1 %vm90_vm1, %v1774_v38 }
 0x76c   :  { %v2405_v54 = vpop.f32.mrf.mxu1 }
 0x76e   :  { %v1847_v55 = vpop.f32.mrf.mxu0 }
 0x76f   :  { %2430 = vmatmul.mubr.msk.f32.vlgmr.msra.gmra.mxu1 %vm90_vm1, %v1847_v55 }
 0x770   :  { %v2410_v36 = vpop.f32.mrf.mxu0 }
 0x776   :  { %v1920_v56 = vpop.f32.mrf.mxu1 }
 0x777   :  { %v1993_v57 = vpop.f32.mrf.mxu0  ;;  %2432 = vmatprep.mubr.msk.f32.mxu1 %vm90_vm1, %v1920_v56 }
 0x778   :  { %v2415_v58 = vpop.f32.mrf.mxu1  ;;  %2433 = vmatmul.mubr.msk.f32.gmra.mxu1 %vm90_vm1, %v1993_v57 }
 0x779   :  { %v2420_v44 = vpop.f32.mrf.mxu0 }
 0x77a   :  { %2552 = shalt.err (!%p2549_p0)
}
 0x77b   :  { %2132 = dma.vmem_to_hbm [thread:$0]  %s2127_s13, 512, %s3032_s9, [#allocation4], %s2590_s16, %s2590_s16, %s2591_s17  }
 0x77c   :  { %v2201_v59 = vld [vmem:[%s3031_s8] ss:$0 sm:$0xff]  ;;  %s2598_s9 = smov [#allocation8]  }
 0x77d   :  { %s2138_s21 = sshll.u32 %s2598_s9, 4  ;;  %s2139_s21 = int_to_ptr.vmem [resolvable:$true] %s2138_s21 }
 0x77e   :  { %s2561_s8 = scalar_lea.vmem %s2139_s21, 512  ;;  %p2566_p2 = scmp.lt.s32.totalorder %s2139_s21, %s2139_s21 }
 0x77f   :  { %p2562_p1 = scmp.ne.s32.totalorder %s2139_s21, %s2561_s8  ;;  %p2567_p3 = scmp.lt.s32.totalorder %s2561_s8, %s2561_s8 }
 0x781   :  { %p2568_p4 = por %p2567_p3, %p2566_p2 }
 0x783   :  { %p2569_p5 = pnand %p2568_p4, %p2562_p1 }
 0x82f   :  { %v2431_v62 = vpop.f32.mrf.mxu1 }
 0x830   :  { %v2092_v46 = vadd.f32 %v2431_v62, %v2201_v59 }
 0x831   :  { %v2086_v45 = vpop.f32.mrf.mxu1 }
 0x832   :  { %v2106_v0 = vmul.f32 0.01, %v2092_v46  ;;  %v2087_v1 = vadd.f32 %v2201_v59, %v2086_v45 }
 0x834   :  { %v2110_v2 = vmax.f32 %v2092_v46, %v2106_v0  ;;  %v2105_v22 = vmul.f32 0.01, %v2087_v1 }
 0x836   :  { %2118 = vst.msk [vmem:[#allocation8 + $0x8] sm:$0xff] %vm90_vm1, %v2110_v2  ;;  %v2109_v27 = vmax.f32 %v2087_v1, %v2105_v22 }
 0x838   :  { %2117 = vst.msk [vmem:[#allocation8] sm:$0xff] %vm90_vm1, %v2109_v27  ;;  %v2434_v48 = vpop.f32.mrf.mxu1 }
 0x839   :  { %v2102_v52 = vadd.f32 %v2434_v48, %v2201_v59 }
 0x83a   :  { %v2096_v24 = vpop.f32.mrf.mxu1 }
 0x83b   :  { %v2108_v53 = vmul.f32 0.01, %v2102_v52  ;;  %v2097_v17 = vadd.f32 %v2201_v59, %v2096_v24 }
 0x83d   :  { %v2112_v3 = vmax.f32 %v2102_v52, %v2108_v53  ;;  %v2107_v19 = vmul.f32 0.01, %v2097_v17 }
 0x83f   :  { %2120 = vst.msk [vmem:[#allocation8 + $0x18] sm:$0xff] %vm90_vm1, %v2112_v3  ;;  %v2111_v61 = vmax.f32 %v2097_v17, %v2107_v19 }
 0x841   :  { %2119 = vst.msk [vmem:[#allocation8 + $0x10] sm:$0xff] %vm90_vm1, %v2111_v61 }
 0x842   :  { %2572 = shalt.err (!%p2569_p5)
}
 0x843   :  { %2144 = dma.vmem_to_hbm [thread:$0]  %s2139_s21, 512, %s3033_s10, [#allocation9], %s2590_s16, %s2590_s16, %s2591_s17  }
 0x844   :  { %2585 = dma.done.wait [#allocation4], 512  }
 0x845   :  { %2586 = vsyncadd [#allocation4], 4294966784 }
 0x846   :  { %2587 = dma.done.wait [#allocation9], 512  }
 0x847   :  { %2588 = vsyncadd [#allocation9], 4294966784 }
 0x848   :  { %2151 = vsyncpa [#allocation3], 1 }
 0x849   :  { %2152 = vsyncpa [#allocation6], 1 }
 0x84a   :  { %2153 = vsyncpa [#allocation4], 1 }
 0x84b   :  { %2154 = vsyncpa [#allocation9], 1 }

</bundles_post_ra>
